<compile_context>
chip_gen: v7x
topology: tpu7x:2x2x1
jax: 0.10.0
libtpu: 0.0.40
codegen_flags: <defaults>
</compile_context>

<pallas_src>
import jax
import jax.numpy as jnp
from jax.experimental import pallas as pl
from jax.experimental.pallas import tpu as pltpu


# ----------------------------------------------------------------------------
# Kernel: numerically-stable softmax over the CHANNEL axis of a block.
# Blocks are either (C, hw_tile) (batch dim squeezed) or (nb, C, HW), so the
# channel axis is always axis -2 and the lane (last) axis stays dense.
# ----------------------------------------------------------------------------
def _softmax_channel_kernel(x_ref, o_ref):
    x = x_ref[...].astype(jnp.float32)
    m = jnp.max(x, axis=-2, keepdims=True)
    e = jnp.exp(x - m)
    s = jnp.sum(e, axis=-2, keepdims=True)
    # Exact divide (NOT approx reciprocal): this kernel is HBM-bandwidth
    # bound, so the divide is free, and it keeps fp32 parity with
    # jax.nn.softmax (the approx path caused the previous allclose failure).
    # NOTE: partial tail tiles run exp() on padded lanes; those lanes are
    # masked on store, so any junk there is harmless by construction.
    o_ref[...] = (e / s).astype(o_ref.dtype)


# Per-block VMEM footprint ≈ in + out double buffers (4 block copies at the
# input dtype) plus ~3 fp32 temporaries (x_f32, e, e/s) inside the body.
# With a 4 MiB fp32 block that is ~28 MiB total, which fits comfortably under
# the explicit 48 MiB scoped-VMEM limit below on v5e/v6e (128 MiB physical)
# and leaves headroom on v7x (64 MiB physical).
_BLOCK_BUDGET_BYTES = 4 << 20     # target input-dtype bytes per block
_VMEM_LIMIT_BYTES = 48 << 20      # explicit scoped-VMEM limit (all generations)


def _round_down_to(v: int, m: int) -> int:
    return (v // m) * m


def softmax_dim1_nchw(x: jax.Array) -> jax.Array:
    """Softmax over the channel axis (dim=1) of an NCHW tensor, via Pallas."""
    N, C, H, W = x.shape
    HW = H * W
    itemsize = jnp.dtype(x.dtype).itemsize
    x3 = x.reshape(N, C, HW)                 # contiguous view — no HBM transpose
    plane_bytes = C * HW * itemsize          # one (C, HW) image plane

    if plane_bytes <= _BLOCK_BUDGET_BYTES:
        # Small/medium planes (incl. the 8x8 chess board, HW = 64 < 128
        # lanes): keep each (C, HW) plane whole (last block dim == full array
        # dim, so < 128 lanes is legal) and fold as many batch elements as
        # fit the block budget into each grid step.  For tiny inputs the
        # whole batch collapses into ONE step, amortizing per-step + dispatch
        # overhead, which dominates at this size.
        nb = min(N, max(1, _BLOCK_BUDGET_BYTES // plane_bytes))
        # v7x megacore: for non-trivial work keep >= 2 parallel grid steps so
        # both TensorCores (and their DMA streams) stay busy.
        if N >= 2 and nb >= N and N * plane_bytes >= (1 << 20):
            nb = pl.cdiv(N, 2)
        grid = (pl.cdiv(N, nb),)
        block = (nb, C, HW)
        in_spec = pl.BlockSpec(block, lambda b: (b, 0, 0))
        out_spec = pl.BlockSpec(block, lambda b: (b, 0, 0))
        dim_sem = ("parallel",)
    else:
        # Large planes: tile the flattened spatial axis with lane-aligned
        # tiles; the batch dim is squeezed so the kernel sees a clean
        # (C, hw_tile) 2-D block and every store is lane-dense.
        hw_tile = max(128, _round_down_to(_BLOCK_BUDGET_BYTES // (C * itemsize), 128))
        if hw_tile >= HW:
            # Huge-C corner case (plane > budget but HW <= ~128 lanes):
            # fall back to whole-plane blocks.
            # TODO(synk): split the channel axis (two-pass / online softmax)
            # if C ever gets large enough to blow the VMEM limit here.
            hw_tile = HW
        grid = (N, pl.cdiv(HW, hw_tile))
        block = (pl.Squeezed(), C, hw_tile)
        in_spec = pl.BlockSpec(block, lambda n, j: (n, 0, j))
        out_spec = pl.BlockSpec(block, lambda n, j: (n, 0, j))
        dim_sem = ("parallel", "parallel")

    out3 = pl.pallas_call(
        _softmax_channel_kernel,
        out_shape=jax.ShapeDtypeStruct((N, C, HW), x.dtype),
        grid=grid,
        in_specs=[in_spec],
        out_specs=out_spec,
        compiler_params=pltpu.CompilerParams(
            dimension_semantics=dim_sem,
            vmem_limit_bytes=_VMEM_LIMIT_BYTES),
    )(x3)

    return out3.reshape(N, C, H, W)


# ----------------------------------------------------------------------------
# Deterministic parameter initialization (same shapes as the PyTorch __init__).
# NOTE: the reference forward discards layer1/layer2 outputs, so these weights
# are intentionally unused by the kernel — created only to mirror the module.
# ----------------------------------------------------------------------------
def init_params(key, input_channels: int, board_size: int, num_moves: int):
    ks = jax.random.split(key, 6)
    return {
        # layer1: three 3x3 convs (OIHW) — dead code in the reference forward
        "conv1_w": jax.random.normal(ks[0], (32, input_channels, 3, 3), jnp.float32) * 0.02,
        "conv1_b": jnp.zeros((32,), jnp.float32),
        "conv2_w": jax.random.normal(ks[1], (64, 32, 3, 3), jnp.float32) * 0.02,
        "conv2_b": jnp.zeros((64,), jnp.float32),
        "conv3_w": jax.random.normal(ks[2], (32, 64, 3, 3), jnp.float32) * 0.02,
        "conv3_b": jnp.zeros((32,), jnp.float32),
        # layer2: three Linear layers — dead code in the reference forward
        "fc1_w": jax.random.normal(ks[3], (board_size * board_size * 64, 128), jnp.float32) * 0.02,
        "fc1_b": jnp.zeros((128,), jnp.float32),
        "fc2_w": jax.random.normal(ks[4], (128, 512), jnp.float32) * 0.02,
        "fc2_b": jnp.zeros((512,), jnp.float32),
        "fc3_w": jax.random.normal(ks[5], (512, num_moves), jnp.float32) * 0.02,
        "fc3_b": jnp.zeros((num_moves,), jnp.float32),
    }


def neural_network_forward(params, x):
    # layer1/layer2 outputs are discarded by the reference forward (dead
    # compute), so they are not executed; the returned value is exactly
    # nn.Softmax(dim=1)(x), computed by the Pallas kernel above.
    del params
    return softmax_dim1_nchw(x)


if __name__ == "__main__":
    # Module-consistent small shapes: board_size=8, num_moves=64.  For
    # layer2's Flatten + Linear(board_size*board_size*64 -> 128) to be
    # shape-consistent with an (N, C, 8, 8) input, C must equal 64.
    input_channels = 64
    board_size = 8
    num_moves = 64
    batch = 2

    key = jax.random.PRNGKey(0)
    k_param, k_x = jax.random.split(key)
    params = init_params(k_param, input_channels, board_size, num_moves)
    x = jax.random.normal(
        k_x, (batch, input_channels, board_size, board_size), jnp.float32)

    out = jax.block_until_ready(neural_network_forward(params, x))

    # Sanity check against the pure-JAX reference of the forward semantics.
    ref = jax.nn.softmax(x, axis=1)
    assert out.shape == x.shape
    assert jnp.allclose(out, ref, atol=1e-6, rtol=1e-6)

    print("KERNEL_OK")
</pallas_src>

<mosaic_0001>
module attributes {stable_mosaic.version = 11 : i64} {
  func.func @_softmax_channel_kernel(%arg0: i32, %arg1: memref<2x64x64xf32, #tpu.memory_space<vmem>>, %arg2: memref<2x64x64xf32, #tpu.memory_space<vmem>>) attributes {dimension_semantics = [#tpu.dimension_semantics<parallel>], iteration_bounds = array<i64: 1>, scalar_prefetch = 0 : i64, scratch_operands = 0 : i64, tpu.core_type = #tpu.core_type<tc>, window_params = [{transform_indices = @transform_0, window_bounds = array<i64: 2, 64, 64>}, {transform_indices = @transform_1, window_bounds = array<i64: 2, 64, 64>}]} {
    %c0 = arith.constant 0 : index
    %c0_0 = arith.constant 0 : index
    %c0_1 = arith.constant 0 : index
    %0 = vector.load %arg1[%c0, %c0_0, %c0_1] : memref<2x64x64xf32, #tpu.memory_space<vmem>>, vector<2x64x64xf32>
    %cst = arith.constant dense<0xFF800000> : vector<2x64xf32>
    %1 = vector.multi_reduction <maximumf>, %0, %cst [1] : vector<2x64x64xf32> to vector<2x64xf32>
    %2 = vector.shape_cast %1 : vector<2x64xf32> to vector<2x1x64xf32>
    %3 = vector.broadcast %2 : vector<2x1x64xf32> to vector<2x64x64xf32>
    %4 = arith.subf %0, %3 : vector<2x64x64xf32>
    %5 = math.exp %4 : vector<2x64x64xf32>
    %cst_2 = arith.constant dense<0.000000e+00> : vector<2x64xf32>
    %6 = vector.multi_reduction <add>, %5, %cst_2 [1] : vector<2x64x64xf32> to vector<2x64xf32>
    %7 = vector.shape_cast %6 : vector<2x64xf32> to vector<2x1x64xf32>
    %8 = vector.broadcast %7 : vector<2x1x64xf32> to vector<2x64x64xf32>
    %9 = arith.divf %5, %8 : vector<2x64x64xf32>
    %c0_3 = arith.constant 0 : index
    %c0_4 = arith.constant 0 : index
    %c0_5 = arith.constant 0 : index
    %10 = vector.load %arg2[%c0_3, %c0_4, %c0_5] : memref<2x64x64xf32, #tpu.memory_space<vmem>>, vector<2x64x64xf32>
    tpu.vector_store %arg2[%c0_3, %c0_4, %c0_5], %9 {strides = array<i32>} : memref<2x64x64xf32, #tpu.memory_space<vmem>>, vector<2x64x64xf32>,
    return
  }
  func.func @transform_0(%arg0: i32) -> (i32, i32, i32) {
    %c0_i32 = arith.constant 0 : i32
    %c0_i32_0 = arith.constant 0 : i32
    %c0_i32_1 = arith.constant 0 : i32
    return %arg0, %c0_i32, %c0_i32_0 : i32, i32, i32
  }
  func.func @transform_1(%arg0: i32) -> (i32, i32, i32) {
    %c0_i32 = arith.constant 0 : i32
    %c0_i32_0 = arith.constant 0 : i32
    %c0_i32_1 = arith.constant 0 : i32
    return %arg0, %c0_i32, %c0_i32_0 : i32, i32, i32
  }
}

</mosaic_0001>

<bundles_post_ra>
// kernel: tpu_custom_call.1
= control target key start
LH: loop header
LB: loop body
LE: loop exit
PB: predicated region body
PF: predicated region fallthrough
CT: control target
= control target key end

     0   :  { %6 = vsyncpa [#allocation3], 0  ;;  %s491_s0 = inlined_call_operand.hbm [shape: f32[2,64,64], index: 0, kind: input, shape index: {}]   ;;  %s492_s1 = inlined_call_operand.hbm [shape: f32[2,64,64], index: 1, kind: output, shape index: {}]  }
   0x1   :  { %7 = vsyncpa [#allocation4], 0  ;;  %s311_s6 = smov [#allocation2]   ;;  %s263_s10 = scalar_lea.hbm %s491_s0, 2048 }
   0x2   :  { %s13_s7 = sshll.u32 %s311_s6, 4  ;;  %p264_p0 = scmp.ne.s32.totalorder %s491_s0, %s263_s10  ;;  %s14_s7 = int_to_ptr.vmem [resolvable:$true] %s13_s7 }
   0x3   :  { %p267_p1 = scmp.lt.u32.totalorder %s263_s10, %s491_s0 }
   0x5   :  { %p269_p2 = pnand %p267_p1, %p264_p0 }
   0x7   :  { %272 = shalt.err (!%p269_p2)
}
   0x8   :  { %s273_s15 = scalar_lea.vmem %s14_s7, 2048  ;;  %p278_p4 = scmp.lt.s32.totalorder %s14_s7, %s14_s7 }
   0x9   :  { %p274_p3 = scmp.ne.s32.totalorder %s14_s7, %s273_s15  ;;  %p279_p5 = scmp.lt.s32.totalorder %s273_s15, %s273_s15 }
   0xb   :  { %p280_p6 = por %p279_p5, %p278_p4 }
   0xd   :  { %p281_p7 = pnand %p280_p6, %p274_p3 }
   0xf   :  { %284 = shalt.err (!%p281_p7)
}
  0x10   :  { %s312_s16 = smov 128   ;;  %s313_s17 = smov 8  }
  0x11   :  { %19 = dma.hbm_to_vmem [thread:$0]  %s491_s0, 2048, %s14_s7, [#allocation3], %s312_s16, %s312_s16, %s313_s17  }
  0x12   :  { %307 = dma.done.wait [#allocation3], 2048  }
  0x13   :  { %308 = vsyncadd [#allocation3], 4294965248  ;;  %vm39_vm0 = vcmask 523264   ;;  %v340_v0 = vld [vmem:[#allocation2] sm:$0xff]  ;;  %v342_v1 = vld [vmem:[#allocation2 + $0x8] sm:$0xff]  ;;  %s314_s0 = smov [#allocation5]  }
  0x14   :  { %v344_v2 = vld [vmem:[#allocation2 + $0x10] sm:$0xff]  ;;  %v346_v3 = vld [vmem:[#allocation2 + $0x18] sm:$0xff]  ;;  %v348_v4 = vld [vmem:[#allocation2 + $0x20] sm:$0xff]  ;;  %v40_v6 = vsel %vm39_vm0, %v340_v0, -inf  ;;  %v41_v7 = vsel %vm39_vm0, %v342_v1, -inf  ;;  %s211_s20 = sshll.u32 %s314_s0, 4  ;;  %s212_s20 = int_to_ptr.vmem [resolvable:$true] %s211_s20 }
  0x15   :  { %v350_v5 = vld [vmem:[#allocation2 + $0x28] sm:$0xff]  ;;  %v42_v8 = vsel %vm39_vm0, %v344_v2, -inf  ;;  %v358_v9 = vld [vmem:[#allocation2 + $0x30] sm:$0xff]  ;;  %v360_v10 = vld [vmem:[#allocation2 + $0x38] sm:$0xff]  ;;  %v44_v12 = vsel %vm39_vm0, %v346_v3, -inf  ;;  %v46_v13 = vsel %vm39_vm0, %v348_v4, -inf  ;;  %p290_p9 = scmp.lt.s32.totalorder %s212_s20, %s212_s20 }
  0x16   :  { %v43_v11 = vmax.f32 %v40_v6, %v42_v8  ;;  %v48_v14 = vsel %vm39_vm0, %v350_v5, -inf  ;;  %v368_v15 = vld [vmem:[#allocation2 + $0x40] sm:$0xff]  ;;  %v45_v16 = vmax.f32 %v41_v7, %v44_v12  ;;  %v50_v17 = vsel %vm39_vm0, %v358_v9, -inf  ;;  %v374_v19 = vld [vmem:[#allocation2 + $0x48] sm:$0xff]  ;;  %v376_v20 = vld [vmem:[#allocation2 + $0x50] sm:$0xff]  ;;  %s285_s21 = scalar_lea.vmem %s212_s20, 2048 }
  0x17   :  { %v52_v18 = vsel %vm39_vm0, %v360_v10, -inf  ;;  %v378_v21 = vld [vmem:[#allocation2 + $0x58] sm:$0xff]  ;;  %v61_v22 = vsel %vm39_vm0, %v368_v15, -inf  ;;  %v382_v24 = vld [vmem:[#allocation2 + $0x60] sm:$0xff]  ;;  %v384_v25 = vld [vmem:[#allocation2 + $0x68] sm:$0xff]  ;;  %v62_v27 = vsel %vm39_vm0, %v374_v19, -inf  ;;  %p286_p8 = scmp.ne.s32.totalorder %s212_s20, %s285_s21  ;;  %p291_p10 = scmp.lt.s32.totalorder %s285_s21, %s285_s21 }
  0x18   :  { %v47_v23 = vmax.f32 %v43_v11, %v46_v13  ;;  %v386_v26 = vld [vmem:[#allocation2 + $0x70] sm:$0xff]  ;;  %v63_v28 = vsel %vm39_vm0, %v376_v20, -inf  ;;  %v65_v29 = vsel %vm39_vm0, %v378_v21, -inf  ;;  %v49_v30 = vmax.f32 %v45_v16, %v48_v14  ;;  %v394_v31 = vld [vmem:[#allocation2 + $0x78] sm:$0xff] }
  0x19   :  { %v64_v32 = vmax.f32 %v61_v22, %v63_v28  ;;  %v66_v33 = vmax.f32 %v62_v27, %v65_v29  ;;  %v67_v34 = vsel %vm39_vm0, %v382_v24, -inf  ;;  %v69_v36 = vsel %vm39_vm0, %v384_v25, -inf  ;;  %p292_p11 = por %p291_p10, %p290_p9 }
  0x1a   :  { %v51_v35 = vmax.f32 %v47_v23, %v50_v17  ;;  %v71_v37 = vsel %vm39_vm0, %v386_v26, -inf  ;;  %v73_v38 = vsel %vm39_vm0, %v394_v31, -inf  ;;  %v53_v39 = vmax.f32 %v49_v30, %v52_v18 }
  0x1b   :  { %v68_v40 = vmax.f32 %v64_v32, %v67_v34  ;;  %v70_v41 = vmax.f32 %v66_v33, %v69_v36  ;;  %p293_p12 = pnand %p292_p11, %p286_p8 }
  0x1c   :  { %v54_v42 = vmax.f32 %v51_v35, %v53_v39 }
  0x1d   :  { %v72_v43 = vmax.f32 %v68_v40, %v71_v37  ;;  %v74_v44 = vmax.f32 %v70_v41, %v73_v38 }
  0x1e   :  { %v55_v45 = vrot.slane %v54_v42, 4 }
  0x1f   :  { %v75_v46 = vmax.f32 %v72_v43, %v74_v44 }
  0x20   :  { %v56_v47 = vmax.f32 %v54_v42, %v55_v45 }
  0x21   :  { %v76_v48 = vrot.slane %v75_v46, 4 }
  0x22   :  { %v57_v49 = vrot.slane %v56_v47, 2 }
  0x23   :  { %v77_v50 = vmax.f32 %v75_v46, %v76_v48 }
  0x24   :  { %v58_v51 = vmax.f32 %v56_v47, %v57_v49 }
  0x25   :  { %v78_v52 = vrot.slane %v77_v50, 2 }
  0x26   :  { %v59_v53 = vrot.slane %v58_v51, 1 }
  0x27   :  { %v79_v54 = vmax.f32 %v77_v50, %v78_v52 }
  0x28   :  { %v60_v55 = vmax.f32 %v58_v51, %v59_v53 }
  0x29   :  { %v80_v56 = vrot.slane %v79_v54, 1 }
  0x2a   :  { %v82_v57 = vsub.f32 %v340_v0, %v60_v55  ;;  %v83_v58 = vsub.f32 %v342_v1, %v60_v55  ;;  %v84_v59 = vsub.f32 %v344_v2, %v60_v55  ;;  %v85_v60 = vsub.f32 %v346_v3, %v60_v55 }
  0x2b   :  { %v86_v61 = vsub.f32 %v348_v4, %v60_v55  ;;  %v87_v62 = vsub.f32 %v350_v5, %v60_v55  ;;  %v88_v63 = vsub.f32 %v358_v9, %v60_v55  ;;  %v81_v11 = vmax.f32 %v79_v54, %v80_v56 }
  0x2c   :  { %v98_v6 = vmul.f32 1.442695, %v82_v57  ;;  %v100_v7 = vmul.f32 1.442695, %v83_v58  ;;  %v102_v8 = vmul.f32 1.442695, %v84_v59  ;;  %v89_v12 = vsub.f32 %v360_v10, %v60_v55 }
  0x2d   :  { %v104_v13 = vmul.f32 1.442695, %v85_v60  ;;  %v106_v0 = vmul.f32 1.442695, %v86_v61  ;;  %v90_v1 = vsub.f32 %v368_v15, %v81_v11  ;;  %v108_v2 = vmul.f32 1.442695, %v87_v62 }
  0x2e   :  { %227 = vpow2.f32 %v98_v6  ;;  %v91_v3 = vsub.f32 %v374_v19, %v81_v11  ;;  %v110_v4 = vmul.f32 1.442695, %v88_v63  ;;  %v92_v5 = vsub.f32 %v376_v20, %v81_v11 }
  0x2f   :  { %229 = vpow2.f32 %v100_v7  ;;  %v112_v9 = vmul.f32 1.442695, %v89_v12  ;;  %v93_v14 = vsub.f32 %v378_v21, %v81_v11  ;;  %v94_v10 = vsub.f32 %v382_v24, %v81_v11 }
  0x30   :  { %231 = vpow2.f32 %v102_v8  ;;  %v114_v16 = vmul.f32 1.442695, %v90_v1  ;;  %v95_v17 = vsub.f32 %v384_v25, %v81_v11  ;;  %v116_v15 = vmul.f32 1.442695, %v91_v3 }
  0x31   :  { %233 = vpow2.f32 %v104_v13  ;;  %v118_v18 = vmul.f32 1.442695, %v92_v5  ;;  %v96_v19 = vsub.f32 %v386_v26, %v81_v11  ;;  %v120_v22 = vmul.f32 1.442695, %v93_v14 }
  0x32   :  { %235 = vpow2.f32 %v106_v0  ;;  %v122_v20 = vmul.f32 1.442695, %v94_v10  ;;  %v97_v23 = vsub.f32 %v394_v31, %v81_v11  ;;  %v124_v21 = vmul.f32 1.442695, %v95_v17 }
  0x33   :  { %237 = vpow2.f32 %v108_v2  ;;  %v126_v28 = vmul.f32 1.442695, %v96_v19 }
  0x34   :  { %239 = vpow2.f32 %v110_v4  ;;  %v128_v33 = vmul.f32 1.442695, %v97_v23 }
  0x35   :  { %241 = vpow2.f32 %v112_v9 }
  0x36   :  { %243 = vpow2.f32 %v114_v16 }
  0x37   :  { %245 = vpow2.f32 %v116_v15 }
  0x38   :  { %v420_v27 = vpop.eup %227  ;;  %247 = vpow2.f32 %v118_v18 }
  0x39   :  { %v422_v24 = vpop.eup %229  ;;  %v130_v25 = vsel %vm39_vm0, %v420_v27, 0.0  ;;  %249 = vpow2.f32 %v120_v22 }
  0x3a   :  { %v426_v29 = vpop.eup %231  ;;  %v131_v26 = vsel %vm39_vm0, %v422_v24, 0.0  ;;  %251 = vpow2.f32 %v122_v20 }
  0x3b   :  { %v430_v30 = vpop.eup %233  ;;  %v132_v31 = vadd.f32 %v131_v26, %v130_v25  ;;  %v133_v32 = vsel %vm39_vm0, %v426_v29, 0.0  ;;  %253 = vpow2.f32 %v124_v21 }
  0x3c   :  { %v236_v34 = vpop.eup %235  ;;  %v135_v35 = vsel %vm39_vm0, %v430_v30, 0.0  ;;  %255 = vpow2.f32 %v126_v28 }
  0x3d   :  { %v238_v36 = vpop.eup %237  ;;  %v134_v37 = vadd.f32 %v133_v32, %v132_v31  ;;  %v137_v39 = vsel %vm39_vm0, %v236_v34, 0.0  ;;  %257 = vpow2.f32 %v128_v33 }
  0x3e   :  { %v240_v38 = vpop.eup %239  ;;  %v139_v43 = vsel %vm39_vm0, %v238_v36, 0.0 }
  0x3f   :  { %v242_v40 = vpop.eup %241  ;;  %v136_v41 = vadd.f32 %v135_v35, %v134_v37  ;;  %v141_v48 = vsel %vm39_vm0, %v240_v38, 0.0 }
  0x40   :  { %v437_v42 = vpop.eup %243  ;;  %v143_v55 = vsel %vm39_vm0, %v242_v40, 0.0 }
  0x41   :  { %v440_v44 = vpop.eup %245  ;;  %v138_v45 = vadd.f32 %v137_v39, %v136_v41  ;;  %v151_v46 = vsel %vm39_vm0, %v437_v42, 0.0 }
  0x42   :  { %v248_v47 = vpop.eup %247  ;;  %v152_v49 = vsel %vm39_vm0, %v440_v44, 0.0 }
  0x43   :  { %v250_v50 = vpop.eup %249  ;;  %v140_v51 = vadd.f32 %v139_v43, %v138_v45  ;;  %v153_v52 = vadd.f32 %v152_v49, %v151_v46  ;;  %v154_v53 = vsel %vm39_vm0, %v248_v47, 0.0 }
  0x44   :  { %v252_v54 = vpop.eup %251  ;;  %v156_v56 = vsel %vm39_vm0, %v250_v50, 0.0 }
  0x45   :  { %v254_v57 = vpop.eup %253  ;;  %v142_v58 = vadd.f32 %v141_v48, %v140_v51  ;;  %v155_v59 = vadd.f32 %v154_v53, %v153_v52  ;;  %v158_v60 = vsel %vm39_vm0, %v252_v54, 0.0 }
  0x46   :  { %v256_v61 = vpop.eup %255  ;;  %v160_v6 = vsel %vm39_vm0, %v254_v57, 0.0 }
  0x47   :  { %v144_v62 = vadd.f32 %v143_v55, %v142_v58  ;;  %v157_v63 = vadd.f32 %v156_v56, %v155_v59  ;;  %v258_v7 = vpop.eup %257  ;;  %v162_v12 = vsel %vm39_vm0, %v256_v61, 0.0 }
  0x48   :  { %v164_v1 = vsel %vm39_vm0, %v258_v7, 0.0 }
  0x49   :  { %v145_v8 = vrot.slane %v144_v62, 4  ;;  %v159_v11 = vadd.f32 %v158_v60, %v157_v63 }
  0x4b   :  { %v146_v13 = vadd.f32 %v145_v8, %v144_v62  ;;  %v161_v0 = vadd.f32 %v160_v6, %v159_v11 }
  0x4d   :  { %v147_v2 = vrot.slane %v146_v13, 2  ;;  %v163_v3 = vadd.f32 %v162_v12, %v161_v0 }
  0x4f   :  { %v148_v4 = vadd.f32 %v147_v2, %v146_v13  ;;  %v165_v5 = vadd.f32 %v164_v1, %v163_v3 }
  0x51   :  { %v149_v9 = vrot.slane %v148_v4, 1  ;;  %v166_v14 = vrot.slane %v165_v5, 4 }
  0x53   :  { %v150_v10 = vadd.f32 %v149_v9, %v148_v4  ;;  %v167_v16 = vadd.f32 %v166_v14, %v165_v5 }
  0x55   :  { %259 = vrcp.f32 %v150_v10  ;;  %v168_v17 = vrot.slane %v167_v16, 2 }
  0x57   :  { %v169_v15 = vadd.f32 %v168_v17, %v167_v16 }
  0x59   :  { %v170_v18 = vrot.slane %v169_v15, 1 }
  0x5b   :  { %v171_v19 = vadd.f32 %v170_v18, %v169_v15 }
  0x5d   :  { %261 = vrcp.f32 %v171_v19 }
  0x5f   :  { %v260_v22 = vpop.eup %259 }
  0x60   :  { %v173_v20 = vmul.f32 %v260_v22, %v420_v27  ;;  %v174_v23 = vmul.f32 %v260_v22, %v422_v24  ;;  %v175_v21 = vmul.f32 %v260_v22, %v426_v29  ;;  %v176_v25 = vmul.f32 %v260_v22, %v430_v30 }
  0x61   :  { %v177_v28 = vmul.f32 %v260_v22, %v236_v34  ;;  %v178_v26 = vmul.f32 %v260_v22, %v238_v36  ;;  %v179_v31 = vmul.f32 %v260_v22, %v240_v38  ;;  %v180_v32 = vmul.f32 %v260_v22, %v242_v40 }
  0x62   :  { %190 = vst.msk [vmem:[#allocation5] sm:$0xff] %vm39_vm0, %v173_v20  ;;  %191 = vst.msk [vmem:[#allocation5 + $0x8] sm:$0xff] %vm39_vm0, %v174_v23 }
  0x63   :  { %192 = vst.msk [vmem:[#allocation5 + $0x10] sm:$0xff] %vm39_vm0, %v175_v21  ;;  %193 = vst.msk [vmem:[#allocation5 + $0x18] sm:$0xff] %vm39_vm0, %v176_v25 }
  0x64   :  { %194 = vst.msk [vmem:[#allocation5 + $0x20] sm:$0xff] %vm39_vm0, %v177_v28  ;;  %195 = vst.msk [vmem:[#allocation5 + $0x28] sm:$0xff] %vm39_vm0, %v178_v26 }
  0x65   :  { %196 = vst.msk [vmem:[#allocation5 + $0x30] sm:$0xff] %vm39_vm0, %v179_v31  ;;  %197 = vst.msk [vmem:[#allocation5 + $0x38] sm:$0xff] %vm39_vm0, %v180_v32 }
  0x67   :  { %v262_v27 = vpop.eup %261 }
  0x68   :  { %v182_v24 = vmul.f32 %v262_v27, %v437_v42  ;;  %v183_v29 = vmul.f32 %v262_v27, %v440_v44  ;;  %v184_v30 = vmul.f32 %v262_v27, %v248_v47  ;;  %v185_v33 = vmul.f32 %v262_v27, %v250_v50 }
  0x69   :  { %v186_v34 = vmul.f32 %v262_v27, %v252_v54  ;;  %v187_v35 = vmul.f32 %v262_v27, %v254_v57  ;;  %v188_v36 = vmul.f32 %v262_v27, %v256_v61  ;;  %v189_v37 = vmul.f32 %v262_v27, %v258_v7 }
  0x6a   :  { %198 = vst.msk [vmem:[#allocation5 + $0x40] sm:$0xff] %vm39_vm0, %v182_v24  ;;  %199 = vst.msk [vmem:[#allocation5 + $0x48] sm:$0xff] %vm39_vm0, %v183_v29 }
  0x6b   :  { %200 = vst.msk [vmem:[#allocation5 + $0x50] sm:$0xff] %vm39_vm0, %v184_v30  ;;  %201 = vst.msk [vmem:[#allocation5 + $0x58] sm:$0xff] %vm39_vm0, %v185_v33 }
  0x6c   :  { %202 = vst.msk [vmem:[#allocation5 + $0x60] sm:$0xff] %vm39_vm0, %v186_v34  ;;  %203 = vst.msk [vmem:[#allocation5 + $0x68] sm:$0xff] %vm39_vm0, %v187_v35 }
  0x6d   :  { %204 = vst.msk [vmem:[#allocation5 + $0x70] sm:$0xff] %vm39_vm0, %v188_v36  ;;  %205 = vst.msk [vmem:[#allocation5 + $0x78] sm:$0xff] %vm39_vm0, %v189_v37 }
  0x6e   :  { %296 = shalt.err (!%p293_p12)
}
  0x6f   :  { %s297_s24 = scalar_lea.hbm %s492_s1, 2048 }
  0x70   :  { %p298_p13 = scmp.ne.s32.totalorder %s492_s1, %s297_s24  ;;  %p301_p0 = scmp.lt.u32.totalorder %s297_s24, %s492_s1 }
  0x72   :  { %p303_p1 = pnand %p301_p0, %p298_p13 }
  0x74   :  { %306 = shalt.err (!%p303_p1)
}
  0x75   :  { %217 = dma.vmem_to_hbm [thread:$0]  %s212_s20, 2048, %s492_s1, [#allocation4], %s312_s16, %s312_s16, %s313_s17  }
  0x76   :  { %309 = dma.done.wait [#allocation4], 2048  }
  0x77   :  { %310 = vsyncadd [#allocation4], 4294965248 }
  0x78   :  { %221 = vsyncpa [#allocation3], 1 }
  0x79   :  { %222 = vsyncpa [#allocation4], 1 }

</bundles_post_ra>
